<compile_context>
chip_gen: v5e
topology: v5e:2x2
jax: 0.10.0
libtpu: 0.0.40
codegen_flags: <defaults>
</compile_context>

<pallas_src>
import functools

import jax
import jax.numpy as jnp
from jax import lax
from jax.experimental import pallas as pl
from jax.experimental.pallas import tpu as pltpu

_LANE = 128      # vreg lane width    -> pad feature dims up to this
_SUBLANE = 8     # vreg sublane width -> pad batch to a multiple of this
_MAX_TILE = 8192  # keeps double-buffered x/out tiles inside 32 MiB scoped VMEM (v7x-safe)


def _round_up(n, m):
    return ((n + m - 1) // m) * m


def _pad_to(a, shape):
    return jnp.pad(a, [(0, s - d) for d, s in zip(a.shape, shape)])


def _odef_block(x, w1, b1, w2, b2):
    """tanh(x @ W1 + b1) @ W2 + b2 with f32 accumulation.

    `x` is f32.  W1/W2 arrive already in the MXU operand dtype (f32 or bf16,
    cast ONCE in the wrapper), so the only per-evaluation casts are on the
    activations (which change every step anyway).  Biases and tanh stay f32.
    """
    op = w1.dtype
    xm = x if x.dtype == op else x.astype(op)
    h = jnp.dot(xm, w1, preferred_element_type=jnp.float32) + b1
    h = jnp.tanh(h)                       # f32 EUP path (safe on v5e)
    hm = h if h.dtype == op else h.astype(op)
    return jnp.dot(hm, w2, preferred_element_type=jnp.float32) + b2


def _forward_kernel(x_ref, w1_ref, b1_ref, w2_ref, b2_ref, o_ref):
    y = _odef_block(x_ref[...].astype(jnp.float32),
                    w1_ref[...], b1_ref[...].astype(jnp.float32),
                    w2_ref[...], b2_ref[...].astype(jnp.float32))
    o_ref[...] = y.astype(o_ref.dtype)


def _euler_kernel(x_ref, w1_ref, b1_ref, w2_ref, b2_ref, o_ref, *,
                  n_steps, dt, unroll):
    # Whole solver runs inside one kernel invocation.  Weight/bias loads (and
    # any dtype handling) are hoisted: nothing weight-related is re-cast or
    # re-loaded inside the loop.  We deliberately do NOT materialize a (tb, H)
    # bias broadcast (VMEM/vreg pressure); the cheap per-iteration sublane
    # broadcast inside the add remains.
    w1 = w1_ref[...]
    b1 = b1_ref[...].astype(jnp.float32)
    w2 = w2_ref[...]
    b2 = b2_ref[...].astype(jnp.float32)
    dtf = jnp.float32(dt)

    def body(_, x):
        return x + dtf * _odef_block(x, w1, b1, w2, b2)

    xf = lax.fori_loop(0, n_steps, body, x_ref[...].astype(jnp.float32),
                       unroll=max(1, min(unroll, n_steps)))
    o_ref[...] = xf.astype(o_ref.dtype)


def _launch(kernel, x, params, *, batch_tile, mxu_dtype, n_evals,
            alias_x_to_out=False):
    """Pad to MXU/vreg-friendly shapes, tile batch on a parallel grid, slice back."""
    w1, b1, w2, b2 = params
    B, D_in = x.shape
    H = w1.shape[1]

    D_pad = _round_up(D_in, _LANE)
    H_pad = _round_up(H, _LANE)
    B_pad = _round_up(B, _SUBLANE)

    # Batch tile: as large as allowed (amortize the ~0.35 us per-grid-step
    # overhead and the x/out DMA), but keep >= 2 grid steps when the batch
    # allows it so the "parallel" axis can split across v7x's two TensorCores,
    # and never exceed _MAX_TILE rows (VMEM budget).
    tb = min(batch_tile, _MAX_TILE, B_pad)
    if B_pad >= 2 * _SUBLANE:
        tb = min(tb, _round_up(B_pad // 2, _SUBLANE))
    tb = max(tb, _SUBLANE)
    B_pad = _round_up(B_pad, tb)

    w_dtype = x.dtype if mxu_dtype is None else mxu_dtype
    x_p = _pad_to(x, (B_pad, D_pad))
    w1_p = _pad_to(w1, (D_pad, H_pad)).astype(w_dtype)   # cast weights ONCE here
    b1_p = _pad_to(b1, (1, H_pad)).astype(jnp.float32)   # biases stay f32
    w2_p = _pad_to(w2, (H_pad, D_pad)).astype(w_dtype)
    b2_p = _pad_to(b2, (1, D_pad)).astype(jnp.float32)

    grid_spec = pltpu.PrefetchScalarGridSpec(
        num_scalar_prefetch=0,
        grid=(B_pad // tb,),
        in_specs=[
            pl.BlockSpec((tb, D_pad), lambda i: (i, 0)),      # x: tiled over batch
            pl.BlockSpec((D_pad, H_pad), lambda i: (0, 0)),   # W1: resident in VMEM
            pl.BlockSpec((1, H_pad), lambda i: (0, 0)),       # b1: resident
            pl.BlockSpec((H_pad, D_pad), lambda i: (0, 0)),   # W2: resident
            pl.BlockSpec((1, D_pad), lambda i: (0, 0)),       # b2: resident
        ],
        out_specs=pl.BlockSpec((tb, D_pad), lambda i: (i, 0)),
    )

    itemsize = jnp.dtype(x.dtype).itemsize
    w_itemsize = jnp.dtype(w_dtype).itemsize
    cost = pl.CostEstimate(
        flops=4 * B_pad * D_pad * H_pad * n_evals,            # 2 matmuls / eval
        transcendentals=B_pad * H_pad * n_evals,              # tanh / eval
        bytes_accessed=(2 * B_pad * D_pad * itemsize          # x in + out
                        + 2 * D_pad * H_pad * w_itemsize      # W1 + W2
                        + (H_pad + D_pad) * 4),               # biases (f32)
    )

    # Only alias when padding actually produced a fresh buffer (donation-safe).
    aliases = {0: 0} if (alias_x_to_out and (B_pad != B or D_pad != D_in)) else {}

    out = pl.pallas_call(
        kernel,
        out_shape=jax.ShapeDtypeStruct((B_pad, D_pad), x.dtype),
        grid_spec=grid_spec,
        compiler_params=pltpu.CompilerParams(
            dimension_semantics=("parallel",),      # batch axis -> megacore split
            vmem_limit_bytes=32 * 1024 * 1024,      # fits v5e/v6e/v7x scoped VMEM
        ),
        cost_estimate=cost,
        input_output_aliases=aliases,
    )(x_p, w1_p, b1_p, w2_p, b2_p)

    return out[:B, :D_in]


def odef_forward(x, t, params, *, batch_tile=2048, mxu_dtype=None):
    """Pallas implementation of ODEF.forward(x, t). `t` is ignored (as in PyTorch).

    Default keeps exact f32 operands (module semantics); pass
    mxu_dtype=jnp.bfloat16 for the faster MXU path (looser numerics).
    """
    del t
    return _launch(_forward_kernel, x, params, batch_tile=batch_tile,
                   mxu_dtype=mxu_dtype, n_evals=1)


def odef_integrate_euler(x0, params, *, n_steps, dt, batch_tile=2048,
                         mxu_dtype=jnp.bfloat16, unroll=4):
    """Fused explicit-Euler integration of dx/dt = ODEF(x, t): all `n_steps`
    dynamics-function evaluations happen inside a single pallas_call.

    bf16 MXU operands are the default (f32 accumulation); pass mxu_dtype=None
    for bit-accurate f32 integration.
    """
    kernel = functools.partial(_euler_kernel, n_steps=n_steps, dt=dt,
                               unroll=unroll)
    return _launch(kernel, x0, params, batch_tile=batch_tile,
                   mxu_dtype=mxu_dtype, n_evals=n_steps, alias_x_to_out=True)


def init_params(key, input_dim, hidden_dim, dtype=jnp.float32):
    """Deterministic init mimicking nn.Linear's default (uniform +/- 1/sqrt(fan_in))."""
    k1, k2, k3, k4 = jax.random.split(key, 4)
    bound1 = 1.0 / (input_dim ** 0.5)
    bound2 = 1.0 / (hidden_dim ** 0.5)
    # PyTorch stores Linear weights as (out, in); we keep them transposed (in, out).
    w1 = jax.random.uniform(k1, (input_dim, hidden_dim), dtype, -bound1, bound1)
    b1 = jax.random.uniform(k2, (1, hidden_dim), dtype, -bound1, bound1)
    w2 = jax.random.uniform(k3, (hidden_dim, input_dim), dtype, -bound2, bound2)
    b2 = jax.random.uniform(k4, (1, input_dim), dtype, -bound2, bound2)
    return w1, b1, w2, b2


def odef_reference(x, params):
    w1, b1, w2, b2 = params
    return jnp.tanh(x @ w1 + b1) @ w2 + b2


def euler_reference(x, params, n_steps, dt):
    for _ in range(n_steps):
        x = x + dt * odef_reference(x, params)
    return x


if __name__ == "__main__":
    key = jax.random.PRNGKey(0)
    k_x, k_p = jax.random.split(key)

    batch, input_dim, hidden_dim = 8, 16, 32
    x = jax.random.normal(k_x, (batch, input_dim), jnp.float32)
    t = jnp.zeros((batch, 1), jnp.float32)     # ignored, as in the PyTorch forward
    params = init_params(k_p, input_dim, hidden_dim)

    # 1) Single forward evaluation (exact f32 module semantics).
    out = jax.block_until_ready(odef_forward(x, t, params))
    ref = odef_reference(x, params)
    assert out.shape == (batch, input_dim)
    assert jnp.allclose(out, ref, atol=1e-5, rtol=1e-5), "forward mismatch"

    # 2) Tiled path: padding (20 -> 24 rows) + >=2-step parallel grid (grid=3).
    xb = jax.random.normal(k_x, (20, input_dim), jnp.float32)
    outb = jax.block_until_ready(odef_forward(xb, None, params, batch_tile=8))
    refb = odef_reference(xb, params)
    assert outb.shape == xb.shape
    assert jnp.allclose(outb, refb, atol=1e-5, rtol=1e-5), "tiled forward mismatch"

    # 3) Fused solver loop, exact f32 MXU operands.
    n_steps, dt = 32, 0.05
    refi = euler_reference(x, params, n_steps, dt)
    xi_f32 = jax.block_until_ready(
        odef_integrate_euler(x, params, n_steps=n_steps, dt=dt, mxu_dtype=None))
    assert xi_f32.shape == x.shape
    assert jnp.allclose(xi_f32, refi, atol=1e-4, rtol=1e-4), "euler f32 mismatch"

    # 4) Fused solver loop with the default bf16 MXU operands (looser tolerance:
    #    operand rounding accumulates over n_steps, as noted in the review).
    xi_bf16 = jax.block_until_ready(
        odef_integrate_euler(x, params, n_steps=n_steps, dt=dt))
    assert xi_bf16.shape == x.shape
    assert jnp.allclose(xi_bf16, refi, atol=3e-2, rtol=3e-2), "euler bf16 mismatch"

    print("KERNEL_OK")
</pallas_src>

<mosaic_0001>
module attributes {stable_mosaic.version = 11 : i64} {
  func.func @_forward_kernel(%arg0: i32, %arg1: memref<8x128xf32, #tpu.memory_space<vmem>>, %arg2: memref<128x128xf32, #tpu.memory_space<vmem>>, %arg3: memref<1x128xf32, #tpu.memory_space<vmem>>, %arg4: memref<128x128xf32, #tpu.memory_space<vmem>>, %arg5: memref<1x128xf32, #tpu.memory_space<vmem>>, %arg6: memref<8x128xf32, #tpu.memory_space<vmem>>) attributes {dimension_semantics = [#tpu.dimension_semantics<parallel>], iteration_bounds = array<i64: 1>, scalar_prefetch = 0 : i64, scratch_operands = 0 : i64, tpu.core_type = #tpu.core_type<tc>, window_params = [{transform_indices = @transform_0, window_bounds = array<i64: 8, 128>}, {pipeline_mode = #tpu.pipeline_mode<synchronous>, transform_indices = @transform_1, window_bounds = array<i64: 128, 128>}, {pipeline_mode = #tpu.pipeline_mode<synchronous>, transform_indices = @transform_2, window_bounds = array<i64: 1, 128>}, {pipeline_mode = #tpu.pipeline_mode<synchronous>, transform_indices = @transform_3, window_bounds = array<i64: 128, 128>}, {pipeline_mode = #tpu.pipeline_mode<synchronous>, transform_indices = @transform_4, window_bounds = array<i64: 1, 128>}, {transform_indices = @transform_5, window_bounds = array<i64: 8, 128>}]} {
    %c0 = arith.constant 0 : index
    %c0_0 = arith.constant 0 : index
    %0 = vector.load %arg1[%c0, %c0_0] : memref<8x128xf32, #tpu.memory_space<vmem>>, vector<8x128xf32>
    %c0_1 = arith.constant 0 : index
    %c0_2 = arith.constant 0 : index
    %1 = vector.load %arg2[%c0_1, %c0_2] : memref<128x128xf32, #tpu.memory_space<vmem>>, vector<128x128xf32>
    %c0_3 = arith.constant 0 : index
    %c0_4 = arith.constant 0 : index
    %2 = vector.load %arg3[%c0_3, %c0_4] : memref<1x128xf32, #tpu.memory_space<vmem>>, vector<1x128xf32>
    %c0_5 = arith.constant 0 : index
    %c0_6 = arith.constant 0 : index
    %3 = vector.load %arg4[%c0_5, %c0_6] : memref<128x128xf32, #tpu.memory_space<vmem>>, vector<128x128xf32>
    %c0_7 = arith.constant 0 : index
    %c0_8 = arith.constant 0 : index
    %4 = vector.load %arg5[%c0_7, %c0_8] : memref<1x128xf32, #tpu.memory_space<vmem>>, vector<1x128xf32>
    %cst = arith.constant dense<0.000000e+00> : vector<8x128xf32>
    %5 = tpu.matmul %0, %1, %cst {dimension_numbers = #tpu.dot_dimension_numbers<[1], [0], [0], [1], [0, 0, 1, 1], [], []>} : vector<8x128xf32>, vector<128x128xf32>, vector<8x128xf32> -> vector<8x128xf32>
    %6 = vector.broadcast %2 : vector<1x128xf32> to vector<8x128xf32>
    %7 = arith.addf %5, %6 : vector<8x128xf32>
    %8 = math.tanh %7 : vector<8x128xf32>
    %cst_9 = arith.constant dense<0.000000e+00> : vector<8x128xf32>
    %9 = tpu.matmul %8, %3, %cst_9 {dimension_numbers = #tpu.dot_dimension_numbers<[1], [0], [0], [1], [0, 0, 1, 1], [], []>} : vector<8x128xf32>, vector<128x128xf32>, vector<8x128xf32> -> vector<8x128xf32>
    %10 = vector.broadcast %4 : vector<1x128xf32> to vector<8x128xf32>
    %11 = arith.addf %9, %10 : vector<8x128xf32>
    %c0_10 = arith.constant 0 : index
    %c0_11 = arith.constant 0 : index
    %12 = vector.load %arg6[%c0_10, %c0_11] : memref<8x128xf32, #tpu.memory_space<vmem>>, vector<8x128xf32>
    tpu.vector_store %arg6[%c0_10, %c0_11], %11 {strides = array<i32>} : memref<8x128xf32, #tpu.memory_space<vmem>>, vector<8x128xf32>,
    return
  }
  func.func @transform_0(%arg0: i32) -> (i32, i32) {
    %c0_i32 = arith.constant 0 : i32
    %c0_i32_0 = arith.constant 0 : i32
    return %arg0, %c0_i32 : i32, i32
  }
  func.func @transform_1(%arg0: i32) -> (i32, i32) {
    %c0_i32 = arith.constant 0 : i32
    %c0_i32_0 = arith.constant 0 : i32
    %c0_i32_1 = arith.constant 0 : i32
    return %c0_i32, %c0_i32_0 : i32, i32
  }
  func.func @transform_2(%arg0: i32) -> (i32, i32) {
    %c0_i32 = arith.constant 0 : i32
    %c0_i32_0 = arith.constant 0 : i32
    %c0_i32_1 = arith.constant 0 : i32
    return %c0_i32, %c0_i32_0 : i32, i32
  }
  func.func @transform_3(%arg0: i32) -> (i32, i32) {
    %c0_i32 = arith.constant 0 : i32
    %c0_i32_0 = arith.constant 0 : i32
    %c0_i32_1 = arith.constant 0 : i32
    return %c0_i32, %c0_i32_0 : i32, i32
  }
  func.func @transform_4(%arg0: i32) -> (i32, i32) {
    %c0_i32 = arith.constant 0 : i32
    %c0_i32_0 = arith.constant 0 : i32
    %c0_i32_1 = arith.constant 0 : i32
    return %c0_i32, %c0_i32_0 : i32, i32
  }
  func.func @transform_5(%arg0: i32) -> (i32, i32) {
    %c0_i32 = arith.constant 0 : i32
    %c0_i32_0 = arith.constant 0 : i32
    return %arg0, %c0_i32 : i32, i32
  }
}

</mosaic_0001>

<bundles_post_ra>
// kernel: tpu_custom_call.1
= control target key start
LH: loop header
LB: loop body
LE: loop exit
PB: predicated region body
PF: predicated region fallthrough
CT: control target
= control target key end

     0   :  { %10 = vsyncpa [#allocation3], 0  ;;  %s333_s0 = inlined_call_operand.hbm [shape: f32[8,128], index: 0, kind: input, shape index: {}]   ;;  %s334_s1 = inlined_call_operand.hbm [shape: f32[128,128], index: 1, kind: input, shape index: {}]   ;;  %s335_s2 = inlined_call_operand.vmem [shape: f32[1,128], index: 2, kind: input, shape index: {}]   ;;  %s336_s3 = inlined_call_operand.hbm [shape: f32[128,128], index: 3, kind: input, shape index: {}]   ;;  %s337_s4 = inlined_call_operand.vmem [shape: f32[1,128], index: 4, kind: input, shape index: {}]   ;;  %s338_s5 = inlined_call_operand.hbm [shape: f32[8,128], index: 5, kind: output, shape index: {}]  }
   0x1   :  { %11 = vsyncpa [#allocation6], 0  ;;  %s28_s20 = sshll.u32 %s334_s1, 4  ;;  %s29_s20 = int_to_ptr.hbm [resolvable:$true] %s28_s20 }
   0x2   :  { %12 = vsyncpa [#allocation4], 0  ;;  %s279_s21 = smov [#allocation5]   ;;  %s18_s25 = sshll.u32 %s333_s0, 4  ;;  %s19_s25 = int_to_ptr.hbm [resolvable:$true] %s18_s25 }
   0x3   :  { %s30_s22 = sshll.u32 %s279_s21, 4  ;;  %s280_s26 = smov 128   ;;  %s31_s22 = int_to_ptr.vmem [resolvable:$true] %s30_s22 }
   0x4   :  { %s281_s27 = smov 8   ;;  %s282_s28 = smov [#allocation2]  }
   0x5   :  { %36 = dma.hbm_to_vmem [thread:$0]  %s29_s20, 2048, %s31_s22, [#allocation6], %s280_s26, %s280_s26, %s281_s27  }
   0x6   :  { %s20_s29 = sshll.u32 %s282_s28, 4  ;;  %s43_s7 = sshll.u32 %s336_s3, 4  ;;  %s21_s29 = int_to_ptr.vmem [resolvable:$true] %s20_s29  ;;  %s44_s7 = int_to_ptr.hbm [resolvable:$true] %s43_s7 }
   0x7   :  { %23 = dma.hbm_to_vmem [thread:$0]  %s19_s25, 128, %s21_s29, [#allocation3]  }
   0x8   :  { %s283_s1 = smov [#allocation7]  }
   0x9   :  { %s45_s8 = sshll.u32 %s283_s1, 4  ;;  %s46_s8 = int_to_ptr.vmem [resolvable:$true] %s45_s8 }
   0xa   :  { %51 = dma.hbm_to_vmem [thread:$0]  %s44_s7, 2048, %s46_s8, [#allocation6], %s280_s26, %s280_s26, %s281_s27  }
   0xb   :  { %273 = dma.done.wait [#allocation3], 128  }
   0xc   :  { %274 = vsyncadd [#allocation3], 4294967168 }
   0xd   :  { %275 = dma.done.wait [#allocation6], 4096  }
   0xe   :  { %276 = vsyncadd [#allocation6], 4294963200  ;;  %v82_v0 = vld [vmem:[#allocation5 + $0x78] sm:$0xff]  ;;  %v81_v1 = vld [vmem:[#allocation5 + $0x70] sm:$0xff]  ;;  %s284_s11 = smov [#allocation8]   ;;  %s156_s15 = sshll.u32 %s338_s5, 4  ;;  %s157_s15 = int_to_ptr.hbm [resolvable:$true] %s156_s15 }
   0xf   :  { %104 = vmatpush.msra.mxu0 %v82_v0  ;;  %v80_v2 = vld [vmem:[#allocation5 + $0x68] sm:$0xff]  ;;  %v79_v3 = vld [vmem:[#allocation5 + $0x60] sm:$0xff]  ;;  %v99_v4 = vld [vmem:[#allocation7 + $0x78] sm:$0xff]  ;;  %s154_s12 = sshll.u32 %s284_s11, 4  ;;  %s155_s12 = int_to_ptr.vmem [resolvable:$true] %s154_s12 }
  0x10   :  { %v78_v5 = vld [vmem:[#allocation5 + $0x58] sm:$0xff]  ;;  %128 = vmatpush.msra.mxu1 %v99_v4  ;;  %v98_v6 = vld [vmem:[#allocation7 + $0x70] sm:$0xff]  ;;  %v97_v7 = vld [vmem:[#allocation7 + $0x68] sm:$0xff] }
  0x11   :  { %105 = vmatpush.msra.mxu0 %v81_v1  ;;  %v77_v8 = vld [vmem:[#allocation5 + $0x50] sm:$0xff]  ;;  %v96_v9 = vld [vmem:[#allocation7 + $0x60] sm:$0xff]  ;;  %v76_v10 = vld [vmem:[#allocation5 + $0x48] sm:$0xff] }
  0x12   :  { %129 = vmatpush.msra.mxu1 %v98_v6  ;;  %v95_v11 = vld [vmem:[#allocation7 + $0x58] sm:$0xff]  ;;  %v75_v12 = vld [vmem:[#allocation5 + $0x40] sm:$0xff]  ;;  %v94_v13 = vld [vmem:[#allocation7 + $0x50] sm:$0xff] }
  0x13   :  { %106 = vmatpush.msra.mxu0 %v80_v2  ;;  %v74_v14 = vld [vmem:[#allocation5 + $0x38] sm:$0xff]  ;;  %v93_v15 = vld [vmem:[#allocation7 + $0x48] sm:$0xff]  ;;  %v73_v16 = vld [vmem:[#allocation5 + $0x30] sm:$0xff] }
  0x14   :  { %130 = vmatpush.msra.mxu1 %v97_v7  ;;  %v92_v17 = vld [vmem:[#allocation7 + $0x40] sm:$0xff]  ;;  %v72_v18 = vld [vmem:[#allocation5 + $0x28] sm:$0xff]  ;;  %v91_v19 = vld [vmem:[#allocation7 + $0x38] sm:$0xff] }
  0x15   :  { %107 = vmatpush.msra.mxu0 %v79_v3  ;;  %v71_v20 = vld [vmem:[#allocation5 + $0x20] sm:$0xff]  ;;  %v90_v21 = vld [vmem:[#allocation7 + $0x30] sm:$0xff]  ;;  %v70_v22 = vld [vmem:[#allocation5 + $0x18] sm:$0xff] }
  0x16   :  { %131 = vmatpush.msra.mxu1 %v96_v9  ;;  %v89_v23 = vld [vmem:[#allocation7 + $0x28] sm:$0xff]  ;;  %v69_v24 = vld [vmem:[#allocation5 + $0x10] sm:$0xff]  ;;  %v67_v26 = vld [vmem:[#allocation5] sm:$0xff] }
  0x17   :  { %108 = vmatpush.msra.mxu0 %v78_v5  ;;  %v68_v25 = vld [vmem:[#allocation5 + $0x8] sm:$0xff]  ;;  %v66_v27 = vld [vmem:[#allocation2] sm:$0xff]  ;;  %v88_v28 = vld [vmem:[#allocation7 + $0x20] sm:$0xff] }
  0x18   :  { %132 = vmatpush.msra.mxu1 %v95_v11  ;;  %v87_v29 = vld [vmem:[#allocation7 + $0x18] sm:$0xff]  ;;  %v86_v30 = vld [vmem:[#allocation7 + $0x10] sm:$0xff]  ;;  %v85_v31 = vld [vmem:[#allocation7 + $0x8] sm:$0xff] }
  0x19   :  { %109 = vmatpush.msra.mxu0 %v77_v8  ;;  %v84_v32 = vld [vmem:[#allocation7] sm:$0xff]  ;;  %v173_v33 = vld [vmem:[%s335_s2] ss:$0 sm:$0xff] }
  0x1a   :  { %133 = vmatpush.msra.mxu1 %v94_v13  ;;  %v174_v37 = vld [vmem:[%s337_s4] ss:$0 sm:$0xff] }
  0x1b   :  { %110 = vmatpush.msra.mxu0 %v76_v10 }
  0x1c   :  { %134 = vmatpush.msra.mxu1 %v93_v15 }
  0x1d   :  { %111 = vmatpush.msra.mxu0 %v75_v12 }
  0x1e   :  { %135 = vmatpush.msra.mxu1 %v92_v17 }
  0x1f   :  { %112 = vmatpush.msra.mxu0 %v74_v14 }
  0x20   :  { %136 = vmatpush.msra.mxu1 %v91_v19 }
  0x21   :  { %113 = vmatpush.msra.mxu0 %v73_v16 }
  0x22   :  { %137 = vmatpush.msra.mxu1 %v90_v21 }
  0x23   :  { %114 = vmatpush.msra.mxu0 %v72_v18 }
  0x24   :  { %138 = vmatpush.msra.mxu1 %v89_v23 }
  0x25   :  { %115 = vmatpush.msra.mxu0 %v71_v20 }
  0x26   :  { %139 = vmatpush.msra.mxu1 %v88_v28 }
  0x27   :  { %116 = vmatpush.msra.mxu0 %v70_v22 }
  0x28   :  { %140 = vmatpush.msra.mxu1 %v87_v29 }
  0x29   :  { %117 = vmatpush.msra.mxu0 %v69_v24 }
  0x2a   :  { %141 = vmatpush.msra.mxu1 %v86_v30 }
  0x2b   :  { %118 = vmatpush.msra.mxu0 %v68_v25 }
  0x2c   :  { %142 = vmatpush.msra.mxu1 %v85_v31 }
  0x2d   :  { %119 = vmatpush.msra.mxu0 %v67_v26 }
  0x2e   :  { %120 = vmatmul.f32.vlgmr.msra.gmra.mxu0 %v66_v27  ;;  %143 = vmatpush.msra.mxu1 %v84_v32 }
  0xab   :  { %v121_v34 = vpop.f32.mrf.mxu0 }
  0xac   :  { %v122_v35 = vadd.f32 %v173_v33, %v121_v34 }
  0xae   :  { %175 = vtanh.f32 %v122_v35 }
  0xb4   :  { %v176_v36 = vpop.eup %175 }
  0xb5   :  { %144 = vmatmul.f32.vlgmr.msra.gmra.mxu1 %v176_v36 }
 0x132   :  { %v145_v38 = vpop.f32.mrf.mxu1 }
 0x133   :  { %v146_v39 = vadd.f32 %v174_v37, %v145_v38 }
 0x135   :  { %148 = vst [vmem:[#allocation8] sm:$0xff] %v146_v39 }
 0x136   :  { %159 = dma.vmem_to_hbm [thread:$0]  %s155_s12, 128, %s157_s15, [#allocation4]  }
 0x137   :  { %277 = dma.done.wait [#allocation4], 128  }
 0x138   :  { %278 = vsyncadd [#allocation4], 4294967168 }
 0x139   :  { %164 = vsyncpa [#allocation3], 1 }
 0x13a   :  { %165 = vsyncpa [#allocation6], 1 }
 0x13b   :  { %166 = vsyncpa [#allocation4], 1 }

</bundles_post_ra>
